<compile_context>
chip_gen: v5e
topology: v5e:2x2
jax: 0.10.0
libtpu: 0.0.40
codegen_flags: <defaults>
</compile_context>

<pallas_src>
import jax
import jax.numpy as jnp
import numpy as np
from jax.experimental import pallas as pl
from jax.experimental.pallas import tpu as pltpu


def _round_up(v, m):
    return ((v + m - 1) // m) * m


def _round_down(v, m):
    return (v // m) * m


def _vmem_capacity_bytes():
    try:
        return int(pltpu.get_tpu_info().vmem_capacity_bytes)
    except Exception:
        return 64 << 20  # conservative (v7x-sized) fallback


def _pick_hw_tile(HW, C1, C_out, itemsize, batch):
    """Budget-aware lane-dense HW tile.

    Returns a tile size that is either the full HW extent (single tile) or a
    multiple of 128 that is <= HW (ragged last tile handled by Pallas masking).
    """
    if HW <= 128:
        return HW  # tiny spatial: single full-extent block

    vmem_cap = _vmem_capacity_bytes()
    budget = int(vmem_cap * 0.6)  # headroom under the scoped limit we request

    # Double-buffered x tile + per-split output tiles, plus (conservatively
    # double-buffered) resident weight + bias.
    fixed = 2 * (C_out * C1 + C_out) * itemsize
    per_t = 2 * (C1 + C_out) * itemsize
    t_budget = max(128, (budget - fixed) // per_t)
    t_cap = min(int(t_budget), 8192)

    if t_cap >= HW:
        # Whole HW row fits in one tile: full-extent block (legal even if
        # HW % 128 != 0, no masking, no padding).
        t = HW
        # Megacore guard: with B==1 a 1-step grid idles one v7x TensorCore.
        if batch < 2 and HW >= 256:
            t = max(128, min(_round_down(HW, 128), _round_up(-(-HW // 2), 128)))
        return t

    # Tiled path: multiple of 128, <= HW.
    t = max(128, _round_down(t_cap, 128))
    # Prefer a nearby exact divisor of HW (avoids a masked edge tile) if one exists.
    if HW % t != 0:
        for cand in range(t, max(128, t // 2) - 1, -128):
            if HW % cand == 0:
                t = cand
                break
    # Megacore guard.
    if batch * (-(-HW // t)) < 2 and HW >= 256:
        t = max(128, min(t, _round_up(-(-HW // 2), 128)))
    return t


def _make_cblinear_kernel(c2s):
    offsets = []
    off = 0
    for c in c2s:
        offsets.append((off, int(c)))
        off += int(c)

    def kernel(w_ref, b_ref, x_ref, *o_refs):
        # w_ref: (C_out, C1)   resident weight tile
        # b_ref: (C_out, 1)    resident bias tile (f32)
        # x_ref: (C1, tHW)     input tile for this (batch, hw-tile) grid point
        # o_refs[i]: (c2s[i], tHW)  per-split output tiles (lane-dense)
        acc = jnp.dot(w_ref[...], x_ref[...],
                      preferred_element_type=jnp.float32) + b_ref[...]
        for (o, c), o_ref in zip(offsets, o_refs):
            o_ref[...] = acc[o:o + c, :].astype(o_ref.dtype)

    return kernel


def cb_linear(x, weight, bias, c2s):
    """CBLinear forward.

    x:      (B, C1, H, W)
    weight: (C_out, C1, 1, 1)   (PyTorch Conv2d weight, k=1)
    bias:   (C_out,)
    Returns a tuple of arrays split along the channel dim per c2s.
    """
    B, C1, H, W = x.shape
    C_out = weight.shape[0]
    c2s = tuple(int(c) for c in c2s)
    assert sum(c2s) == C_out
    assert weight.shape[1] == C1 and weight.shape[2] == 1 and weight.shape[3] == 1, (
        "only the k=1, s=1, g=1 pointwise path is implemented")  # TODO(synk): general conv
    HW = H * W

    # Free layout: NCHW -> (B, C1, HW); no HBM transpose / pad passes.
    x_flat = x.reshape(B, C1, HW)
    w2d = weight.reshape(C_out, C1).astype(x.dtype)   # bf16 inputs -> bf16 MXU path
    b2d = bias.reshape(C_out, 1).astype(jnp.float32)  # added on the f32 accumulator

    itemsize = jnp.dtype(x.dtype).itemsize
    tHW = _pick_hw_tile(HW, C1, C_out, itemsize, B)
    n_hw = pl.cdiv(HW, tHW)

    vmem_cap = _vmem_capacity_bytes()
    vmem_limit = max(32 << 20, min(int(vmem_cap * 0.75), 112 << 20))

    out_shapes = tuple(jax.ShapeDtypeStruct((B, c, HW), x.dtype) for c in c2s)
    out_specs = [pl.BlockSpec((None, c, tHW), lambda b, t: (b, 0, t)) for c in c2s]

    outs_flat = pl.pallas_call(
        _make_cblinear_kernel(c2s),
        out_shape=out_shapes,
        grid_spec=pltpu.PrefetchScalarGridSpec(
            num_scalar_prefetch=0,
            grid=(B, n_hw),
            in_specs=[
                # weight & bias: same block for every grid point -> stay resident
                pl.BlockSpec((C_out, C1), lambda b, t: (0, 0)),
                pl.BlockSpec((C_out, 1), lambda b, t: (0, 0)),
                # x: batch dim squeezed, HW tiled (ragged last tile masked by Pallas)
                pl.BlockSpec((None, C1, tHW), lambda b, t: (b, 0, t)),
            ],
            out_specs=out_specs,
        ),
        compiler_params=pltpu.CompilerParams(
            dimension_semantics=("parallel", "parallel"),
            vmem_limit_bytes=vmem_limit,
        ),
    )(w2d, b2d, x_flat)

    # Free reshapes per split (no data movement, no post-hoc slicing pass).
    return tuple(o.reshape(B, c, H, W) for o, c in zip(outs_flat, c2s))


def _reference(x, weight, bias, c2s):
    """Pure-JAX reference matching the PyTorch 1x1-conv + split forward."""
    w2d = weight.reshape(weight.shape[0], weight.shape[1])
    y = jnp.einsum("oc,bchw->bohw", w2d, x) + bias[None, :, None, None]
    outs = []
    off = 0
    for c in c2s:
        outs.append(y[:, off:off + c])
        off += c
    return tuple(outs)


def _run_case(key, B, C1, H, W, c2s, dtype=jnp.float32):
    C_out = sum(c2s)
    kx, kw, kb = jax.random.split(key, 3)
    x = jax.random.normal(kx, (B, C1, H, W), dtype=dtype)
    weight = jax.random.normal(kw, (C_out, C1, 1, 1), dtype=jnp.float32) * 0.1
    bias = jax.random.normal(kb, (C_out,), dtype=jnp.float32) * 0.1

    outs = cb_linear(x, weight, bias, c2s)
    outs = jax.block_until_ready(outs)

    refs = _reference(x.astype(jnp.float32), weight, bias, c2s)
    assert len(outs) == len(c2s)
    for o, r, c in zip(outs, refs, c2s):
        assert o.shape == (B, c, H, W)
        np.testing.assert_allclose(np.asarray(o, dtype=np.float32), np.asarray(r),
                                   rtol=1e-4, atol=1e-4)


if __name__ == "__main__":
    key = jax.random.PRNGKey(0)
    k0, k1 = jax.random.split(key, 2)

    # Small shapes consistent with the module: c1=4, c2s=(4, 8, 16), 16x16 spatial.
    _run_case(k0, B=2, C1=4, H=16, W=16, c2s=(4, 8, 16))

    # Exercises the non-128-divisible HW path (masked edge tile) + megacore guard.
    _run_case(k1, B=1, C1=8, H=20, W=20, c2s=(4, 8))

    print("KERNEL_OK")
</pallas_src>

<mosaic_0001>
module attributes {stable_mosaic.version = 11 : i64} {
  func.func @kernel(%arg0: i32, %arg1: i32, %arg2: memref<28x4xf32, #tpu.memory_space<vmem>>, %arg3: memref<28x1xf32, #tpu.memory_space<vmem>>, %arg4: memref<1x4x256xf32, #tpu.memory_space<vmem>>, %arg5: memref<1x4x256xf32, #tpu.memory_space<vmem>>, %arg6: memref<1x8x256xf32, #tpu.memory_space<vmem>>, %arg7: memref<1x16x256xf32, #tpu.memory_space<vmem>>) attributes {dimension_semantics = [#tpu.dimension_semantics<parallel>, #tpu.dimension_semantics<parallel>], iteration_bounds = array<i64: 2, 1>, scalar_prefetch = 0 : i64, scratch_operands = 0 : i64, tpu.core_type = #tpu.core_type<tc>, window_params = [{pipeline_mode = #tpu.pipeline_mode<synchronous>, transform_indices = @transform_0, window_bounds = array<i64: 28, 4>}, {pipeline_mode = #tpu.pipeline_mode<synchronous>, transform_indices = @transform_1, window_bounds = array<i64: 28, 1>}, {transform_indices = @transform_2, window_bounds = array<i64: 1, 4, 256>}, {transform_indices = @transform_3, window_bounds = array<i64: 1, 4, 256>}, {transform_indices = @transform_4, window_bounds = array<i64: 1, 8, 256>}, {transform_indices = @transform_5, window_bounds = array<i64: 1, 16, 256>}]} {
    %c0 = arith.constant 0 : index
    %c0_0 = arith.constant 0 : index
    %0 = vector.load %arg2[%c0, %c0_0] : memref<28x4xf32, #tpu.memory_space<vmem>>, vector<28x4xf32>
    %c0_1 = arith.constant 0 : index
    %c0_2 = arith.constant 0 : index
    %c0_3 = arith.constant 0 : index
    %1 = vector.load %arg4[%c0_1, %c0_2, %c0_3] : memref<1x4x256xf32, #tpu.memory_space<vmem>>, vector<1x4x256xf32>
    %2 = vector.shape_cast %1 : vector<1x4x256xf32> to vector<4x256xf32>
    %cst = arith.constant dense<0.000000e+00> : vector<28x256xf32>
    %3 = tpu.matmul %0, %2, %cst {dimension_numbers = #tpu.dot_dimension_numbers<[1], [0], [0], [1], [0, 0, 1, 1], [], []>} : vector<28x4xf32>, vector<4x256xf32>, vector<28x256xf32> -> vector<28x256xf32>
    %c0_4 = arith.constant 0 : index
    %c0_5 = arith.constant 0 : index
    %4 = vector.load %arg3[%c0_4, %c0_5] : memref<28x1xf32, #tpu.memory_space<vmem>>, vector<28x1xf32>
    %5 = vector.broadcast %4 : vector<28x1xf32> to vector<28x256xf32>
    %6 = arith.addf %3, %5 : vector<28x256xf32>
    %7 = vector.extract_strided_slice %6 {offsets = [0, 0], sizes = [4, 256], strides = [1, 1]} : vector<28x256xf32> to vector<4x256xf32>
    %c0_6 = arith.constant 0 : index
    %c0_7 = arith.constant 0 : index
    %c0_8 = arith.constant 0 : index
    %8 = vector.load %arg5[%c0_6, %c0_7, %c0_8] : memref<1x4x256xf32, #tpu.memory_space<vmem>>, vector<1x4x256xf32>
    %9 = vector.shape_cast %8 : vector<1x4x256xf32> to vector<4x256xf32>
    %10 = vector.shape_cast %7 : vector<4x256xf32> to vector<1x4x256xf32>
    tpu.vector_store %arg5[%c0_6, %c0_7, %c0_8], %10 {strides = array<i32>} : memref<1x4x256xf32, #tpu.memory_space<vmem>>, vector<1x4x256xf32>,
    %11 = vector.extract_strided_slice %6 {offsets = [4, 0], sizes = [8, 256], strides = [1, 1]} : vector<28x256xf32> to vector<8x256xf32>
    %c0_9 = arith.constant 0 : index
    %c0_10 = arith.constant 0 : index
    %c0_11 = arith.constant 0 : index
    %12 = vector.load %arg6[%c0_9, %c0_10, %c0_11] : memref<1x8x256xf32, #tpu.memory_space<vmem>>, vector<1x8x256xf32>
    %13 = vector.shape_cast %12 : vector<1x8x256xf32> to vector<8x256xf32>
    %14 = vector.shape_cast %11 : vector<8x256xf32> to vector<1x8x256xf32>
    tpu.vector_store %arg6[%c0_9, %c0_10, %c0_11], %14 {strides = array<i32>} : memref<1x8x256xf32, #tpu.memory_space<vmem>>, vector<1x8x256xf32>,
    %15 = vector.extract_strided_slice %6 {offsets = [12, 0], sizes = [16, 256], strides = [1, 1]} : vector<28x256xf32> to vector<16x256xf32>
    %c0_12 = arith.constant 0 : index
    %c0_13 = arith.constant 0 : index
    %c0_14 = arith.constant 0 : index
    %16 = vector.load %arg7[%c0_12, %c0_13, %c0_14] : memref<1x16x256xf32, #tpu.memory_space<vmem>>, vector<1x16x256xf32>
    %17 = vector.shape_cast %16 : vector<1x16x256xf32> to vector<16x256xf32>
    %18 = vector.shape_cast %15 : vector<16x256xf32> to vector<1x16x256xf32>
    tpu.vector_store %arg7[%c0_12, %c0_13, %c0_14], %18 {strides = array<i32>} : memref<1x16x256xf32, #tpu.memory_space<vmem>>, vector<1x16x256xf32>,
    return
  }
  func.func @transform_0(%arg0: i32, %arg1: i32) -> (i32, i32) {
    %c0_i32 = arith.constant 0 : i32
    %c0_i32_0 = arith.constant 0 : i32
    %c0_i32_1 = arith.constant 0 : i32
    return %c0_i32, %c0_i32_0 : i32, i32
  }
  func.func @transform_1(%arg0: i32, %arg1: i32) -> (i32, i32) {
    %c0_i32 = arith.constant 0 : i32
    %c0_i32_0 = arith.constant 0 : i32
    %c0_i32_1 = arith.constant 0 : i32
    return %c0_i32, %c0_i32_0 : i32, i32
  }
  func.func @transform_2(%arg0: i32, %arg1: i32) -> (i32, i32, i32) {
    %c0_i32 = arith.constant 0 : i32
    %c0_i32_0 = arith.constant 0 : i32
    return %arg0, %c0_i32, %arg1 : i32, i32, i32
  }
  func.func @transform_3(%arg0: i32, %arg1: i32) -> (i32, i32, i32) {
    %c0_i32 = arith.constant 0 : i32
    %c0_i32_0 = arith.constant 0 : i32
    return %arg0, %c0_i32, %arg1 : i32, i32, i32
  }
  func.func @transform_4(%arg0: i32, %arg1: i32) -> (i32, i32, i32) {
    %c0_i32 = arith.constant 0 : i32
    %c0_i32_0 = arith.constant 0 : i32
    return %arg0, %c0_i32, %arg1 : i32, i32, i32
  }
  func.func @transform_5(%arg0: i32, %arg1: i32) -> (i32, i32, i32) {
    %c0_i32 = arith.constant 0 : i32
    %c0_i32_0 = arith.constant 0 : i32
    return %arg0, %c0_i32, %arg1 : i32, i32, i32
  }
}

</mosaic_0001>

<bundles_post_ra>
// kernel: tpu_custom_call.1
= control target key start
LH: loop header
LB: loop body
LE: loop exit
PB: predicated region body
PF: predicated region fallthrough
CT: control target
= control target key end

     0   :  { %11 = vsyncpa [#allocation3], 0  ;;  %s1124_s0 = inlined_call_operand.vmem [shape: f32[28,4], index: 0, kind: input, shape index: {}]   ;;  %s1125_s1 = inlined_call_operand.vmem [shape: f32[28,1], index: 1, kind: input, shape index: {}]   ;;  %s1126_s2 = inlined_call_operand.vmem [shape: f32[2,4,256], index: 2, kind: input, shape index: {}]   ;;  %s1127_s3 = inlined_call_operand.hbm [shape: f32[2,4,256], index: 3, kind: output, shape index: {0}]   ;;  %s1128_s4 = inlined_call_operand.hbm [shape: f32[2,8,256], index: 4, kind: output, shape index: {1}]   ;;  %s1129_s5 = inlined_call_operand.hbm [shape: f32[2,16,256], index: 5, kind: output, shape index: {2}]  }
   0x1   :  { %13 = vsyncpa [#allocation3 + $0x1], 0 }
   0x2   :  { %14 = vsyncpa [#allocation5], 0 }
   0x3   :  { %16 = vsyncpa [#allocation5 + $0x1], 0  ;;  %s914_s18 = smov 0   ;;  %s916_s19 = smov 0  }
   0x4   :  { %s918_s20 = smov 0   ;;  %s920_s21 = smov 0  }
   0x5   :  { %s922_s22 = smov 0   ;;  %s924_s23 = smov 0  }
   0x6 LB: > { %s1131_s24 = sadd.s32 4294967295, %s879_s23   ;;  %s1130_s25 = sadd.s32 4294967294, %s879_s23   ;;  %s879_s23 = sphi %s924_s23, %s22_s23   ;;  %s875_s22 = sphi %s922_s22, %s1141_s22   ;;  %s871_s21 = sphi %s920_s21, %s1140_s21   ;;  %s867_s20 = sphi %s918_s20, %s1139_s20   ;;  %s863_s19 = sphi %s916_s19, %s1138_s19   ;;  %s859_s18 = sphi %s914_s18, %s1137_s18  }
   0x7   : > { %s34_s26 = sadd.s32 1, %s875_s22  ;;  %s113_s27 = sadd.s32 1, %s867_s20 }
   0x8   : > { %p36_p0 = scmp.ge.s32.totalorder %s34_s26, 2  ;;  %p123_p1 = scmp.ne.s32.totalorder %s867_s20, %s863_s19 }
   0x9   : > { %p124_p2 = scmp.eq.s32.totalorder %s1131_s24, 1  ;;  %p129_p3 = scmp.ne.s32.totalorder %s863_s19, %s859_s18 }
   0xa   : > { %s1143_s26 = smov (%p36_p0, %s34_s26), 0  ;;  %p130_p5 = scmp.eq.s32.totalorder %s1130_s25, 1 }
   0xb   : > { %p956_p4 = por %p124_p2, %p123_p1  ;;  %s108_s29 = ssub.s32 %s875_s22, %s1143_s26 }
   0xc   : > { %p638_p6 = scmp.ge.s32.totalorder %s879_s23, 1  ;;  %p111_p7 = scmp.eq.s32.totalorder %s108_s29, 0 }
   0xd   : > { %p965_p8 = por %p130_p5, %p129_p3  ;;  %p223_p9 = scmp.lt.s32.totalorder %s879_s23, 3 }
   0xe   : > { %s971_s6 = scalar_select %p111_p7, %s867_s20, %s113_s27  }
   0xf   : > { %p224_p10 = pnand %p638_p6, %p223_p9 }
  0x10   : > { %p266_p11 = scmp.lt.s32.totalorder (!%p224_p10), %s871_s21, 1  ;;  %s666_s16 = sshll.u32 (!%p224_p10), %s871_s21, 3 }
  0x11   : > { %227 = sbr.rel (%p224_p10) target bundleno = 204 (0xcc), region = 32  ;;  %s448_s7 = scalar_lea.hbm (!%p224_p10), %s1127_s3, %s666_s16 }
  0x12   : > { %s452_s10 = sshll.u32 (!%p224_p10), %s448_s7, 4  ;;  %s667_s11 = sshll.u32 (!%p224_p10), %s871_s21, 4  ;;  %s453_s10 = int_to_ptr.hbm [resolvable:$true] %s452_s10 }
  0x13   : > { %s755_s16 = sshra.s32 (!%p224_p10), %s453_s10, 4  ;;  %s761_s7 = scalar_lea.hbm (!%p224_p10), %s1127_s3, 16  ;;  %s756_s16 = int_to_ptr.hbm [resolvable:$true] %s755_s16 }
  0x14   : > { %p762_p1 = scmp.lt.s32.totalorder (!%p224_p10), %s756_s16, %s1127_s3 }
  0x16   : > { %v881_v0 = vmov 0   ;;  %v283_v1 = vld [vmem:[%s1125_s1] sm:$0xff]  ;;  %s267_s9 = scalar_select %p266_p11, %s871_s21, 1  ;;  %v285_v2 = vld [vmem:[%s1125_s1 + $0x10] sm:$0xff]  ;;  %v284_v4 = vld [vmem:[%s1125_s1 + $0x8] sm:$0xff]  ;;  %vm324_vm0 = vcmask 1043456  }
  0x17   : > { %739 = vset.pattern.permute.xlu0 %v881_v0  ;;  %740 = vset.pattern.permute.xlu1 %v881_v0  ;;  %v286_v5 = vld [vmem:[%s1125_s1 + $0x18] sm:$0xf]  ;;  %v278_v6 = vld [vmem:[%s1124_s0] sm:$0xff]  ;;  %vm311_vm1 = vcmask 31744   ;;  %v280_v7 = vld [vmem:[%s1124_s0 + $0x10] sm:$0xff] }
  0x18   : > { %289 = vperm.xlu0 %739, %v283_v1   ;;  %299 = vperm.xlu1 %740, %v285_v2   ;;  %s665_s12 = sshll.u32 %s267_s9, 3  ;;  %v279_v10 = vld [vmem:[%s1124_s0 + $0x8] sm:$0xff]  ;;  %v281_v11 = vld [vmem:[%s1124_s0 + $0x18] sm:$0xf] }
  0x19   : > { %s273_s15 = scalar_lea.vmem %s1126_s2, %s665_s12 }
  0x1a   : > { %v282_v3 = vld [vmem:[%s273_s15] sm:$0xff]  ;;  %s1015_s15 = sand.u32 1, %s863_s19  }
  0x1b   : > { %308 = vst [vmem:[#allocation1] ss:$2 sm:$0xff] %v282_v3  ;;  %s639_s17 = sshll.u32 %s1015_s15, 3  ;;  %s640_s13 = sshll.u32 %s1015_s15, 4 }
  0x1c   : > { %s250_s8 = scalar_lea.vmem [#allocation2], %s639_s17  ;;  %s425_s14 = scalar_lea.sflag [#allocation3], %s1015_s15 }
  0x1d   : > { %s450_s9 = sshll.u32 %s250_s8, 4  ;;  %s757_s17 = scalar_lea.hbm %s756_s16, 8  ;;  %s451_s9 = int_to_ptr.vmem [resolvable:$true] %s450_s9 }
  0x1e   : > { %p758_p12 = scmp.ne.s32.totalorder %s756_s16, %s757_s17  ;;  %p763_p2 = scmp.lt.s32.totalorder %s761_s7, %s757_s17 }
  0x20   : > { %294 = vperm.xlu0 %739, %v284_v4   ;;  %304 = vperm.xlu1 %740, %v286_v5   ;;  %p759_p13 = pnand %p758_p12, %p956_p4  ;;  %p764_p3 = por %p763_p2, %p762_p1 }
  0x22   : > { %v309_v8 = vld.sshfl [vmem:[#allocation1] sm:$0xff pattern:$0x75316420]  ;;  %v310_v9 = vld.sshfl [vmem:[#allocation1 + $0x8] sm:$0xff pattern:$0x75316420]  ;;  %p760_p0 = pneg %p759_p13 }
  0x23   : > { %644 = vmatpush.msk.msra.mxu0 %vm324_vm0, %v309_v8  ;;  %669 = vmatpush.msk.msra.mxu2 %vm324_vm0, %v309_v8 }
  0x24   : > { %649 = vmatpush.msk.msra.mxu1 %vm324_vm0, %v310_v9  ;;  %670 = vmatpush.msk.msra.mxu3 %vm324_vm0, %v310_v9  ;;  %p765_p5 = pnand %p764_p3, %p760_p0 }
  0x25   : > { %645 = vmatmul.msk.f32.vlgmr.msra.gmra.mxu0 %vm311_vm1, %v278_v6  ;;  %647 = vmatmul.msk.f32.vlgmr.msra.gmra.mxu2 %vm311_vm1, %v280_v7 }
  0x26   : > { %650 = vmatmul.msk.f32.vlgmr.msra.gmra.mxu1 %vm311_vm1, %v278_v6  ;;  %652 = vmatmul.msk.f32.vlgmr.msra.gmra.mxu3 %vm311_vm1, %v280_v7 }
  0x2d   : > { %646 = vmatmul.msk.f32.gmra.mxu0 %vm311_vm1, %v279_v10  ;;  %648 = vmatmul.msk.f32.gmra.mxu2 %vm311_vm1, %v281_v11 }
  0x2e   : > { %651 = vmatmul.msk.f32.gmra.mxu1 %vm311_vm1, %v279_v10  ;;  %653 = vmatmul.msk.f32.gmra.mxu3 %vm311_vm1, %v281_v11 }
  0x8a   : > { %v290_v12 = vpop.permute.xlu0 %289  ;;  %v300_v17 = vpop.permute.xlu1 %299 }
  0x92   : > { %v295_v23 = vpop.permute.xlu0 %294 }
  0xa2   : > { %v346_v13 = vpop.f32.mrf.mxu0 }
  0xa3   : > { %v375_v14 = vpop.f32.mrf.mxu1  ;;  %v347_v15 = vadd.f32 %v346_v13, %v290_v12 }
  0xa4   : > { %v376_v16 = vadd.f32 %v375_v14, %v290_v12 }
  0xa6   : > { %v389_v18 = vrot.slane %v376_v16, 4 }
  0xa8   : > { %v352_v19 = vpop.f32.mrf.mxu2  ;;  %v390_v20 = vsel %vm324_vm0, %v347_v15, %v389_v18 }
  0xa9   : > { %v1024_v21 = vadd.f32 %v352_v19, %v300_v17  ;;  %v381_v22 = vpop.f32.mrf.mxu3  ;;  %392 = vst [vmem:[%s250_s8] sm:$0xff] %v390_v20 }
  0xaa   : > { %v1028_v24 = vadd.f32 %v381_v22, %v300_v17  ;;  %v349_v25 = vpop.f32.mrf.mxu0 }
  0xab   : > { %768 = shalt.err (!%p765_p5)
}
  0xac   : > { %671 = dma.vmem_to_hbm [thread:$0]  (%p956_p4), %s451_s9, 128, %s453_s10, %s425_s14   ;;  %v350_v26 = vadd.f32 %v349_v25, %v295_v23  ;;  %v378_v27 = vpop.f32.mrf.mxu1  ;;  %v395_v29 = vrot.slane %v347_v15, 4  ;;  %v408_v30 = vrot.slane %v1024_v21, 4  ;;  %v410_v32 = vrot.slane %v1028_v24, 4  ;;  %v305_v36 = vpop.permute.xlu1 %304 }
  0xad   : > { %s465_s27 = scalar_lea.hbm %s1128_s4, %s667_s11  ;;  %v379_v28 = vadd.f32 %v378_v27, %v295_v23  ;;  %s668_s29 = sshll.u32 %s871_s21, 5 }
  0xae   : > { %v396_v31 = vrot.slane %v350_v26, 4  ;;  %s1134_s25 = sadd.s32 4294967295, %s879_s23   ;;  %s257_s9 = scalar_lea.vmem [#allocation4], %s640_s13 }
  0xaf   : > { %s1048_s12 = sand.u32 1, %s1134_s25   ;;  %v398_v33 = vrot.slane %v379_v28, 4  ;;  %s467_s10 = sshll.u32 %s257_s9, 4  ;;  %s468_s10 = int_to_ptr.vmem [resolvable:$true] %s467_s10 }
  0xb0   : > { %s469_s14 = sshll.u32 %s465_s27, 4  ;;  %v397_v34 = vsel %vm324_vm0, %v395_v29, %v396_v31  ;;  %v409_v35 = vsel %vm324_vm0, %v396_v31, %v408_v30  ;;  %s1056_s21 = scalar_lea.hbm %s1129_s5, %s668_s29  ;;  %v355_v39 = vpop.f32.mrf.mxu2  ;;  %s470_s14 = int_to_ptr.hbm [resolvable:$true] %s469_s14 }
  0xb1   : > { %s1135_s16 = sshll.u32 %s1015_s15, 5  ;;  %v399_v37 = vsel %vm324_vm0, %v389_v18, %v398_v33  ;;  %v411_v38 = vsel %vm324_vm0, %v398_v33, %v410_v32  ;;  %v356_v40 = vadd.f32 %v355_v39, %v305_v36  ;;  %v384_v41 = vpop.f32.mrf.mxu3  ;;  %402 = vst [vmem:[%s257_s9] sm:$0xff] %v397_v34  ;;  %s485_s15 = sshll.u32 %s1056_s21, 4  ;;  %s486_s15 = int_to_ptr.hbm [resolvable:$true] %s485_s15 }
  0xb2   : > { %s1060_s17 = scalar_lea.vmem [#allocation6], %s1135_s16  ;;  %v385_v42 = vadd.f32 %v384_v41, %v305_v36  ;;  %403 = vst [vmem:[%s257_s9 + $0x8] sm:$0xff] %v399_v37  ;;  %s430_s7 = scalar_lea.sflag [#allocation5], %s1048_s12 }
  0xb3   : > { %420 = vst [vmem:[%s1060_s17] sm:$0xff] %v409_v35  ;;  %s483_s13 = sshll.u32 %s1060_s17, 4  ;;  %v412_v43 = vrot.slane %v356_v40, 4  ;;  %s783_s8 = sshra.s32 %s470_s14, 4  ;;  %s1068_s13 = int_to_ptr.vmem [resolvable:$true] %s483_s13  ;;  %s784_s8 = int_to_ptr.hbm [resolvable:$true] %s783_s8 }
  0xb4   : > { %421 = vst [vmem:[%s1060_s17 + $0x8] sm:$0xff] %v411_v38  ;;  %v414_v44 = vrot.slane %v385_v42, 4  ;;  %s785_s27 = scalar_lea.hbm %s784_s8, 16  ;;  %s789_s24 = scalar_lea.hbm %s1128_s4, 32 }
  0xb5   : > { %p786_p6 = scmp.ne.s32.totalorder %s784_s8, %s785_s27  ;;  %p790_p10 = scmp.lt.s32.totalorder %s784_s8, %s1128_s4 }
  0xb6   : > { %p791_p11 = scmp.lt.s32.totalorder %s789_s24, %s785_s27 }
  0xb7   : > { %p787_p7 = pnand %p786_p6, %p956_p4 }
  0xb8   : > { %p792_p12 = por %p791_p11, %p790_p10 }
  0xb9   : > { %p788_p9 = pneg %p787_p7 }
  0xbb   : > { %p793_p13 = pnand %p792_p12, %p788_p9 }
  0xbd   : > { %796 = shalt.err (!%p793_p13)
}
  0xbe   : > { %672 = dma.vmem_to_hbm [thread:$0]  (%p956_p4), %s468_s10, 256, %s470_s14, %s430_s7   ;;  %v413_v45 = vsel %vm324_vm0, %v408_v30, %v412_v43  ;;  %v415_v46 = vsel %vm324_vm0, %v410_v32, %v414_v44 }
  0xbf   : > { %422 = vst [vmem:[%s1060_s17 + $0x10] sm:$0xff] %v413_v45  ;;  %s811_s9 = sshra.s32 %s486_s15, 4  ;;  %s817_s29 = scalar_lea.hbm %s1129_s5, 64  ;;  %s812_s9 = int_to_ptr.hbm [resolvable:$true] %s811_s9 }
  0xc0   : > { %423 = vst [vmem:[%s1060_s17 + $0x18] sm:$0xff] %v415_v46  ;;  %s813_s21 = scalar_lea.hbm %s812_s9, 32  ;;  %p818_p3 = scmp.lt.s32.totalorder %s812_s9, %s1129_s5 }
  0xc1   : > { %p814_p0 = scmp.ne.s32.totalorder %s812_s9, %s813_s21  ;;  %p819_p5 = scmp.lt.s32.totalorder %s817_s29, %s813_s21 }
  0xc3   : > { %p815_p1 = pnand %p814_p0, %p956_p4  ;;  %p820_p6 = por %p819_p5, %p818_p3 }
  0xc5   : > { %p816_p2 = pneg %p815_p1 }
  0xc7   : > { %p821_p7 = pnand %p820_p6, %p816_p2 }
  0xc9   : > { %824 = shalt.err (!%p821_p7)
}
  0xca   : > { %s882_s14 = smov 256   ;;  %s883_s17 = smov 16  }
  0xcb   : > { %673 = dma.vmem_to_hbm [thread:$0]  (%p956_p4), %s1068_s13, 512, %s486_s15, %s430_s7, %s882_s14, %s882_s14, %s883_s17  }
  0xcc PF: > { %p687_p9 = scmp.ge.s32.totalorder %s879_s23, 2  ;;  %s500_s24 = sand.u32 1, %s859_s18  }
  0xcd   : > { %s501_s11 = scalar_lea.sflag [#allocation3], %s500_s24 }
  0xce   : > { %p678_p10 = pnand %p687_p9, %p965_p8 }
  0xd0   : > { %p679_p11 = pneg %p678_p10 }
  0xd2   : > { %850 = dma.done.wait (%p679_p11), %s501_s11, 128  }
  0xd3   : > { %852 = vsyncadd (%p679_p11), %s501_s11, 4294967168  ;;  %s1136_s16 = sadd.s32 4294967294, %s879_s23  }
  0xd4   : > { %s510_s9 = sand.u32 1, %s1136_s16  }
  0xd5   : > { %s511_s21 = scalar_lea.sflag [#allocation5], %s510_s9 }
  0xd6   : > { %854 = dma.done.wait (%p679_p11), %s511_s21, 768  }
  0xd7   : > { %856 = vsyncadd (%p679_p11), %s511_s21, 4294966528  ;;  %s22_s23 = sadd.s32 1, %s879_s23   ;;  %s1137_s18 = smov %s863_s19 }
  0xd8   : > { %p19_p4 = scmp.ge.s32.totalorder %s22_s23, 4   ;;  %s1138_s19 = smov %s867_s20 }
  0xd9   : > { %s1139_s20 = smov %s971_s6  ;;  %s1140_s21 = smov %s875_s22 }
  0xda   : > { %s1141_s22 = smov %s1143_s26  ;;  %21 = sbr.rel (!%p19_p4) target bundleno = 6 (0x6), region = 99 }
  0xdf   :  { %527 = vsyncpa [#allocation3], 1 }
  0xe0   :  { %529 = vsyncpa [#allocation3 + $0x1], 1 }
  0xe1   :  { %530 = vsyncpa [#allocation5], 1 }
  0xe2   :  { %532 = vsyncpa [#allocation5 + $0x1], 1 }

</bundles_post_ra>
